<compile_context>
chip_gen: v7x
topology: tpu7x:2x2x1
jax: 0.10.0
libtpu: 0.0.40
codegen_flags: <defaults>
</compile_context>

<pallas_src>
from typing import NamedTuple, Optional

import jax
import jax.numpy as jnp
from jax import lax
from jax.experimental import pallas as pl
from jax.experimental.pallas import tpu as pltpu


def _round_up(x: int, m: int) -> int:
    return ((x + m - 1) // m) * m


def _glu_kernel(x_ref, w_ref, b_ref, o_ref):
    to = o_ref.shape[-1]                               # O tile (multiple of 128)
    x = x_ref[...]                                     # (tm, D)
    # Canonical MXU contraction: (tm, D) . (D, 2*to) -> (tm, 2*to), f32 acc.
    y = lax.dot_general(
        x, w_ref[...],
        dimension_numbers=(((1,), (0,)), ((), ())),
        preferred_element_type=jnp.float32,
    )
    y = y + b_ref[...]                                 # bias already f32, bcast over rows
    g = y[:, :to]                                      # lane-aligned gate / value halves
    v = y[:, to:]
    # sigmoid(g) = 1 / (1 + exp(-g)); exp + approx reciprocal both run on the EUP.
    s = pl.reciprocal(1.0 + jnp.exp(-g), approx=True)
    o_ref[...] = (s * v).astype(o_ref.dtype)


class GLUParams(NamedTuple):
    w_fused: jax.Array    # (D, 2*O_pad): [g_tile0 | v_tile0 | g_tile1 | v_tile1 | ...]
    b_fused: jax.Array    # (1, 2*O_pad), float32, same interleaving
    input_dim: int
    output_dim: int
    o_pad: int
    o_tile: int


def prepare_glu_params(weight, bias, *,
                       compute_dtype: Optional[jnp.dtype] = None,
                       weight_tile_budget_bytes: int = 16 * 1024 * 1024) -> GLUParams:
    """One-time packing of nn.Linear(input_dim, 2*output_dim) parameters.

    Hoisted out of the per-call path: transposes to (D, O) (MXU-native,
    lane-dense), zero-pads O to a multiple of 128, chooses an O tile so the
    per-step weight footprint stays under `weight_tile_budget_bytes`, and
    interleaves gate/value columns per O tile so one fused dot serves both.
    """
    two_o, d = weight.shape
    assert two_o % 2 == 0 and bias.shape == (two_o,)
    o = two_o // 2
    if compute_dtype is not None:
        weight = weight.astype(compute_dtype)

    o_pad = max(128, _round_up(o, 128))
    w_item = jnp.dtype(weight.dtype).itemsize

    # O tile: full O_pad unless the (both-halves) weight tile would blow the budget.
    o_tile = o_pad
    while 2 * o_tile * d * w_item > weight_tile_budget_bytes and o_tile % 256 == 0:
        o_tile //= 2
    n_tiles = o_pad // o_tile

    wg = weight[:o].T                                  # (D, O)
    wv = weight[o:].T
    bg = bias[:o].astype(jnp.float32)
    bv = bias[o:].astype(jnp.float32)
    pad = o_pad - o
    if pad:
        wg = jnp.pad(wg, ((0, 0), (0, pad)))
        wv = jnp.pad(wv, ((0, 0), (0, pad)))
        bg = jnp.pad(bg, (0, pad))
        bv = jnp.pad(bv, (0, pad))

    w_fused = jnp.stack(
        [wg.reshape(d, n_tiles, o_tile), wv.reshape(d, n_tiles, o_tile)], axis=2
    ).reshape(d, 2 * o_pad)
    b_fused = jnp.stack(
        [bg.reshape(n_tiles, o_tile), bv.reshape(n_tiles, o_tile)], axis=1
    ).reshape(1, 2 * o_pad)
    return GLUParams(w_fused, b_fused, d, o, o_pad, o_tile)


def gated_linear_unit(x, params: GLUParams, *, tm: int = 512):
    """x: (..., input_dim) -> (..., output_dim)."""
    *lead, d = x.shape
    assert d == params.input_dim
    o, o_pad, to = params.output_dim, params.o_pad, params.o_tile
    n_o = o_pad // to

    compute_dtype = params.w_fused.dtype
    x2 = x.reshape(-1, d)
    if x2.dtype != compute_dtype:
        x2 = x2.astype(compute_dtype)
    m = x2.shape[0]

    # M tile: as large as the problem allows, multiple of 8; keep >=2 programs
    # along the M axis when possible so v7x's two TensorCores both get work.
    tm = max(8, min(_round_up(tm, 8), _round_up(m, 8)))
    if -(-m // tm) < 2 and tm > 8:
        tm = max(8, _round_up(tm // 2, 8))
    m_pad = _round_up(m, tm)
    if m_pad != m:
        x2 = jnp.pad(x2, ((0, m_pad - m), (0, 0)))

    # --- Accurate VMEM budget (headroom-aware, <= 48 MiB so v7x still fits). ---
    x_item = jnp.dtype(x2.dtype).itemsize
    out_item = jnp.dtype(x.dtype).itemsize
    w_item = jnp.dtype(params.w_fused.dtype).itemsize
    resident_w = n_o == 1                              # constant index_map -> resident slab
    w_bufs = 1 if resident_w else 2
    vmem_bytes = (
        2 * tm * d * x_item                            # double-buffered x tiles
        + 2 * tm * to * out_item                       # double-buffered out tiles
        + w_bufs * d * 2 * to * w_item                 # weight tile(s)
        + w_bufs * 8 * 2 * to * 4                      # bias tile(s), sublane-padded f32
        + 2 * tm * 2 * to * 4                          # f32 matmul result + epilogue temps
    )
    vmem_limit = int(min(max(vmem_bytes + (4 << 20), 8 << 20), 48 << 20))

    grid = (m_pad // tm, n_o)

    def _build(single_buffer_weights):
        w_mode = {}
        if single_buffer_weights:
            # Resident params never change block -> 1 buffer halves their VMEM use.
            w_mode = dict(pipeline_mode=pl.Buffered(1))
        return pl.pallas_call(
            _glu_kernel,
            out_shape=jax.ShapeDtypeStruct((m_pad, o_pad), x.dtype),
            grid=grid,
            in_specs=[
                pl.BlockSpec((tm, d), lambda i, j: (i, 0)),            # x tile (streams)
                pl.BlockSpec((d, 2 * to), lambda i, j: (0, j), **w_mode),   # fused W tile
                pl.BlockSpec((1, 2 * to), lambda i, j: (0, j), **w_mode),   # fused bias tile
            ],
            out_specs=pl.BlockSpec((tm, to), lambda i, j: (i, j)),
            compiler_params=pltpu.CompilerParams(
                dimension_semantics=("parallel", "parallel"),
                vmem_limit_bytes=vmem_limit,
            ),
        )

    try:
        out = _build(resident_w)(x2, params.w_fused, params.b_fused)
    except Exception:
        # Fallback if pl.Buffered(1) is rejected by this jax version: default buffering.
        out = _build(False)(x2, params.w_fused, params.b_fused)

    out = out[:m, :o]
    return out.reshape(*lead, o)


if __name__ == "__main__":
    key = jax.random.PRNGKey(0)
    batch, seq, input_dim, output_dim = 2, 8, 32, 32

    kx, kw, kb = jax.random.split(key, 3)
    x = jax.random.normal(kx, (batch, seq, input_dim), dtype=jnp.float32)
    # Deterministic synthetic params matching nn.Linear(input_dim, output_dim * 2).
    weight = jax.random.normal(kw, (2 * output_dim, input_dim), dtype=jnp.float32) * 0.1
    bias = jax.random.normal(kb, (2 * output_dim,), dtype=jnp.float32) * 0.1

    # One-time parameter packing (hoisted out of the call path).
    # TODO(synk): pass compute_dtype=jnp.bfloat16 here for v6e/v7x MXU throughput
    # (requires relaxing the tolerance below to ~1e-2).
    params = prepare_glu_params(weight, bias)

    out = gated_linear_unit(x, params)
    out = jax.block_until_ready(out)

    # Pure-JAX reference for correctness.
    y = x @ weight.T + bias
    gates, values = y[..., :output_dim], y[..., output_dim:]
    ref = jax.nn.sigmoid(gates) * values

    assert out.shape == (batch, seq, output_dim)
    # approx=True EUP reciprocal in the sigmoid epilogue -> ~1e-4-level deltas.
    assert jnp.allclose(out, ref, atol=5e-3, rtol=5e-3), float(jnp.max(jnp.abs(out - ref)))
    print("KERNEL_OK")
</pallas_src>

<mosaic_0001>
module attributes {stable_mosaic.version = 11 : i64} {
  func.func @_glu_kernel(%arg0: i32, %arg1: i32, %arg2: memref<8x32xf32, #tpu.memory_space<vmem>>, %arg3: memref<32x256xf32, #tpu.memory_space<vmem>>, %arg4: memref<1x256xf32, #tpu.memory_space<vmem>>, %arg5: memref<8x128xf32, #tpu.memory_space<vmem>>) attributes {dimension_semantics = [#tpu.dimension_semantics<parallel>, #tpu.dimension_semantics<parallel>], iteration_bounds = array<i64: 2, 1>, scalar_prefetch = 0 : i64, scratch_operands = 0 : i64, tpu.core_type = #tpu.core_type<tc>, window_params = [{transform_indices = @transform_0, window_bounds = array<i64: 8, 32>}, {pipeline_mode = #tpu.pipeline_mode<synchronous>, transform_indices = @transform_1, window_bounds = array<i64: 32, 256>}, {pipeline_mode = #tpu.pipeline_mode<synchronous>, transform_indices = @transform_2, window_bounds = array<i64: 1, 256>}, {transform_indices = @transform_3, window_bounds = array<i64: 8, 128>}]} {
    %c0 = arith.constant 0 : index
    %c0_0 = arith.constant 0 : index
    %0 = vector.load %arg2[%c0, %c0_0] : memref<8x32xf32, #tpu.memory_space<vmem>>, vector<8x32xf32>
    %c0_1 = arith.constant 0 : index
    %c0_2 = arith.constant 0 : index
    %1 = vector.load %arg3[%c0_1, %c0_2] : memref<32x256xf32, #tpu.memory_space<vmem>>, vector<32x256xf32>
    %cst = arith.constant dense<0.000000e+00> : vector<8x256xf32>
    %2 = tpu.matmul %0, %1, %cst {dimension_numbers = #tpu.dot_dimension_numbers<[1], [0], [0], [1], [0, 0, 1, 1], [], []>} : vector<8x32xf32>, vector<32x256xf32>, vector<8x256xf32> -> vector<8x256xf32>
    %c0_3 = arith.constant 0 : index
    %c0_4 = arith.constant 0 : index
    %3 = vector.load %arg4[%c0_3, %c0_4] : memref<1x256xf32, #tpu.memory_space<vmem>>, vector<1x256xf32>
    %4 = vector.broadcast %3 : vector<1x256xf32> to vector<8x256xf32>
    %5 = arith.addf %2, %4 : vector<8x256xf32>
    %6 = vector.extract_strided_slice %5 {offsets = [0, 0], sizes = [8, 128], strides = [1, 1]} : vector<8x256xf32> to vector<8x128xf32>
    %7 = vector.extract_strided_slice %5 {offsets = [0, 128], sizes = [8, 128], strides = [1, 1]} : vector<8x256xf32> to vector<8x128xf32>
    %cst_5 = arith.constant 0.000000e+00 : f32
    %8 = vector.broadcast %cst_5 : f32 to vector<8x128xf32>
    %9 = arith.subf %8, %6 : vector<8x128xf32>
    %10 = math.exp %9 : vector<8x128xf32>
    %cst_6 = arith.constant 1.000000e+00 : f32
    %11 = vector.broadcast %cst_6 : f32 to vector<8x128xf32>
    %12 = arith.addf %11, %10 : vector<8x128xf32>
    %13 = tpu.reciprocal %12 {approx = true} : vector<8x128xf32> -> vector<8x128xf32>
    %14 = arith.mulf %13, %7 : vector<8x128xf32>
    %c0_7 = arith.constant 0 : index
    %c0_8 = arith.constant 0 : index
    %15 = vector.load %arg5[%c0_7, %c0_8] : memref<8x128xf32, #tpu.memory_space<vmem>>, vector<8x128xf32>
    tpu.vector_store %arg5[%c0_7, %c0_8], %14 {strides = array<i32>} : memref<8x128xf32, #tpu.memory_space<vmem>>, vector<8x128xf32>,
    return
  }
  func.func @transform_0(%arg0: i32, %arg1: i32) -> (i32, i32) {
    %c0_i32 = arith.constant 0 : i32
    %c0_i32_0 = arith.constant 0 : i32
    return %arg0, %c0_i32 : i32, i32
  }
  func.func @transform_1(%arg0: i32, %arg1: i32) -> (i32, i32) {
    %c0_i32 = arith.constant 0 : i32
    %c0_i32_0 = arith.constant 0 : i32
    return %c0_i32, %arg1 : i32, i32
  }
  func.func @transform_2(%arg0: i32, %arg1: i32) -> (i32, i32) {
    %c0_i32 = arith.constant 0 : i32
    %c0_i32_0 = arith.constant 0 : i32
    return %c0_i32, %arg1 : i32, i32
  }
  func.func @transform_3(%arg0: i32, %arg1: i32) -> (i32, i32) {
    %c0_i32 = arith.constant 0 : i32
    return %arg0, %arg1 : i32, i32
  }
}

module attributes {stable_mosaic.version = 11 : i64} {
  func.func @_glu_kernel(%arg0: i32, %arg1: i32, %arg2: memref<8x32xf32, #tpu.memory_space<vmem>>, %arg3: memref<32x256xf32, #tpu.memory_space<vmem>>, %arg4: memref<1x256xf32, #tpu.memory_space<vmem>>, %arg5: memref<8x128xf32, #tpu.memory_space<vmem>>) attributes {dimension_semantics = [#tpu.dimension_semantics<parallel>, #tpu.dimension_semantics<parallel>], iteration_bounds = array<i64: 2, 1>, scalar_prefetch = 0 : i64, scratch_operands = 0 : i64, tpu.core_type = #tpu.core_type<tc>, window_params = [{transform_indices = @transform_0, window_bounds = array<i64: 8, 32>}, {transform_indices = @transform_1, window_bounds = array<i64: 32, 256>}, {transform_indices = @transform_2, window_bounds = array<i64: 1, 256>}, {transform_indices = @transform_3, window_bounds = array<i64: 8, 128>}]} {
    %c0 = arith.constant 0 : index
    %c0_0 = arith.constant 0 : index
    %0 = vector.load %arg2[%c0, %c0_0] : memref<8x32xf32, #tpu.memory_space<vmem>>, vector<8x32xf32>
    %c0_1 = arith.constant 0 : index
    %c0_2 = arith.constant 0 : index
    %1 = vector.load %arg3[%c0_1, %c0_2] : memref<32x256xf32, #tpu.memory_space<vmem>>, vector<32x256xf32>
    %cst = arith.constant dense<0.000000e+00> : vector<8x256xf32>
    %2 = tpu.matmul %0, %1, %cst {dimension_numbers = #tpu.dot_dimension_numbers<[1], [0], [0], [1], [0, 0, 1, 1], [], []>} : vector<8x32xf32>, vector<32x256xf32>, vector<8x256xf32> -> vector<8x256xf32>
    %c0_3 = arith.constant 0 : index
    %c0_4 = arith.constant 0 : index
    %3 = vector.load %arg4[%c0_3, %c0_4] : memref<1x256xf32, #tpu.memory_space<vmem>>, vector<1x256xf32>
    %4 = vector.broadcast %3 : vector<1x256xf32> to vector<8x256xf32>
    %5 = arith.addf %2, %4 : vector<8x256xf32>
    %6 = vector.extract_strided_slice %5 {offsets = [0, 0], sizes = [8, 128], strides = [1, 1]} : vector<8x256xf32> to vector<8x128xf32>
    %7 = vector.extract_strided_slice %5 {offsets = [0, 128], sizes = [8, 128], strides = [1, 1]} : vector<8x256xf32> to vector<8x128xf32>
    %cst_5 = arith.constant 0.000000e+00 : f32
    %8 = vector.broadcast %cst_5 : f32 to vector<8x128xf32>
    %9 = arith.subf %8, %6 : vector<8x128xf32>
    %10 = math.exp %9 : vector<8x128xf32>
    %cst_6 = arith.constant 1.000000e+00 : f32
    %11 = vector.broadcast %cst_6 : f32 to vector<8x128xf32>
    %12 = arith.addf %11, %10 : vector<8x128xf32>
    %13 = tpu.reciprocal %12 {approx = true} : vector<8x128xf32> -> vector<8x128xf32>
    %14 = arith.mulf %13, %7 : vector<8x128xf32>
    %c0_7 = arith.constant 0 : index
    %c0_8 = arith.constant 0 : index
    %15 = vector.load %arg5[%c0_7, %c0_8] : memref<8x128xf32, #tpu.memory_space<vmem>>, vector<8x128xf32>
    tpu.vector_store %arg5[%c0_7, %c0_8], %14 {strides = array<i32>} : memref<8x128xf32, #tpu.memory_space<vmem>>, vector<8x128xf32>,
    return
  }
  func.func @transform_0(%arg0: i32, %arg1: i32) -> (i32, i32) {
    %c0_i32 = arith.constant 0 : i32
    %c0_i32_0 = arith.constant 0 : i32
    return %arg0, %c0_i32 : i32, i32
  }
  func.func @transform_1(%arg0: i32, %arg1: i32) -> (i32, i32) {
    %c0_i32 = arith.constant 0 : i32
    %c0_i32_0 = arith.constant 0 : i32
    return %c0_i32, %arg1 : i32, i32
  }
  func.func @transform_2(%arg0: i32, %arg1: i32) -> (i32, i32) {
    %c0_i32 = arith.constant 0 : i32
    %c0_i32_0 = arith.constant 0 : i32
    return %c0_i32, %arg1 : i32, i32
  }
  func.func @transform_3(%arg0: i32, %arg1: i32) -> (i32, i32) {
    %c0_i32 = arith.constant 0 : i32
    return %arg0, %arg1 : i32, i32
  }
}

</mosaic_0001>

<bundles_post_ra>
// kernel: tpu_custom_call.1
= control target key start
LH: loop header
LB: loop body
LE: loop exit
PB: predicated region body
PF: predicated region fallthrough
CT: control target
= control target key end

     0   :  { %8 = vsyncpa [#allocation3], 0  ;;  %s962_s0 = inlined_call_operand.hbm [shape: f32[16,32], index: 0, kind: input, shape index: {}]   ;;  %s963_s1 = inlined_call_operand.hbm [shape: f32[32,256], index: 1, kind: input, shape index: {}]   ;;  %s964_s2 = inlined_call_operand.vmem [shape: f32[1,256], index: 2, kind: input, shape index: {}]   ;;  %s965_s3 = inlined_call_operand.hbm [shape: f32[16,128], index: 3, kind: output, shape index: {}]  }
   0x1   :  { %10 = vsyncpa [#allocation3 + $0x1], 0 }
   0x2   :  { %11 = vsyncpa [#allocation6], 0 }
   0x3   :  { %12 = vsyncpa [#allocation4], 0 }
   0x4   :  { %14 = vsyncpa [#allocation4 + $0x1], 0  ;;  %s741_s12 = smov 0   ;;  %s743_s13 = smov 0  }
   0x5   :  { %s745_s14 = smov 0   ;;  %s747_s15 = smov 0  }
   0x6   :  { %s749_s16 = smov 0   ;;  %s751_s17 = smov 0  }
   0x7 LB: > { %s464_s18 = sadd.s32 4294967295, %s713_s17   ;;  %s465_s19 = sadd.s32 4294967294, %s713_s17   ;;  %s713_s17 = sphi %s751_s17, %s20_s17   ;;  %s709_s16 = sphi %s749_s16, %s989_s16   ;;  %s705_s15 = sphi %s747_s15, %s988_s15   ;;  %s701_s14 = sphi %s745_s14, %s987_s14   ;;  %s697_s13 = sphi %s743_s13, %s986_s13   ;;  %s693_s12 = sphi %s741_s12, %s985_s12  }
   0x8   : > { %p52_p0 = scmp.ne.s32.totalorder %s697_s13, %s693_s12  ;;  %p775_p1 = scmp.eq.s32.totalorder %s464_s18, 0 }
   0x9   : > { %p779_p2 = scmp.eq.s32.totalorder %s464_s18, 1  ;;  %p136_p3 = scmp.eq.s32.totalorder %s465_s19, 1 }
   0xa   : > { %s970_s20 = scalar_select %p775_p1, 1, 0 }
   0xb   : > { %s971_s21 = scalar_select %p779_p2, 1, 0 }
   0xc   : > { %p785_p4 = por %p775_p1, %p52_p0  ;;  %p466_p5 = scmp.ge.s32.totalorder %s713_s17, 1 }
   0xd   : > { %p790_p6 = por %p136_p3, %p52_p0  ;;  %p143_p7 = scmp.lt.s32.totalorder %s713_s17, 3 }
   0xe   : > { %s972_s22 = scalar_select %p785_p4, 1, 0 }
   0xf   : > { %s973_s23 = scalar_select %p790_p6, 1, 0 }
  0x10   : > { %p795_p8 = pnand %p466_p5, %p143_p7  ;;  %s715_s25 = smov [#allocation5]  }
  0x11   : > { %s158_s26 = sshll.u32 %s715_s25, 4  ;;  %s32_s28 = sadd.s32 1, %s709_s16  ;;  %s159_s26 = int_to_ptr.vmem [resolvable:$true] %s158_s26 }
  0x12   : > { %s974_s24 = scalar_select %p795_p8, 1, 0 }
  0x13   : > { %p497_p9 = pneg %p795_p8  ;;  %s569_s4 = scalar_lea.hbm %s963_s1, 1024 }
  0x14   : > { %p570_p12 = scmp.ne.s32.totalorder %s963_s1, %s569_s4  ;;  %p576_p5 = scmp.lt.u32.totalorder %s569_s4, %s963_s1 }
  0x15   : > { %p804_p11 = pnand %p497_p9, %p775_p1 }
  0x17   : > { %p571_p13 = pneg %p804_p11 }
  0x19   : > { %p572_p0 = pnand %p571_p13, %p570_p12 }
  0x1b   : > { %p573_p3 = pneg %p572_p0 }
  0x1d   : > { %p578_p7 = pnand %p576_p5, %p573_p3 }
  0x1f   : > { %581 = shalt.err (!%p578_p7)
}
  0x20   : > { %s582_s9 = scalar_lea.vmem %s159_s26, 1024  ;;  %p590_p1 = scmp.lt.s32.totalorder %s159_s26, %s159_s26 }
  0x21   : > { %p583_p9 = scmp.ne.s32.totalorder %s159_s26, %s582_s9  ;;  %p591_p4 = scmp.lt.s32.totalorder %s582_s9, %s582_s9 }
  0x23   : > { %p585_p10 = pnand %p583_p9, %p571_p13  ;;  %p592_p8 = por %p591_p4, %p590_p1 }
  0x25   : > { %p586_p6 = pneg %p585_p10 }
  0x27   : > { %p593_p2 = pnand %p592_p8, %p586_p6 }
  0x29   : > { %596 = shalt.err (!%p593_p2)
}
  0x2a   : > { %s716_s10 = smov 256   ;;  %s717_s11 = smov 16  }
  0x2b   : > { %500 = dma.hbm_to_vmem [thread:$0]  (!%p804_p11), %s963_s1, 1024, %s159_s26, [#allocation6], %s716_s10, %s716_s10, %s717_s11  }
  0x2c   : > { %p34_p1 = scmp.ge.s32.totalorder %s32_s28, 2  ;;  %s39_s25 = sadd.s32 1, %s701_s14 }
  0x2d   : > { %p46_p2 = scmp.ne.s32.totalorder %s701_s14, %s697_s13  ;;  %p47_p4 = scmp.eq.s32.totalorder %s713_s17, 0 }
  0x2e   : > { %s991_s28 = smov (%p34_p1, %s32_s28), 0  ;;  %p977_p8 = scmp.ne.s32.totalorder %s971_s21, 0 }
  0x2f   : > { %p831_p6 = por %p47_p4, %p46_p2  ;;  %s36_s27 = ssub.s32 %s709_s16, %s991_s28 }
  0x30   : > { %p837_p10 = por %p977_p8, %p46_p2  ;;  %p510_p12 = scmp.lt.s32.totalorder %s713_s17, 2 }
  0x31   : > { %p37_p11 = scmp.eq.s32.totalorder %s36_s27, 0  ;;  %s180_s26 = sand.u32 1, %s701_s14  }
  0x32   : > { %s470_s4 = sshll.u32 %s180_s26, 3  ;;  %s471_s6 = sshll.u32 %s709_s16, 7 }
  0x33   : > { %s846_s5 = scalar_select %p37_p11, %s701_s14, %s39_s25  }
  0x34   : > { %s852_s9 = scalar_lea.hbm %s962_s0, %s471_s6  ;;  %s184_s21 = scalar_lea.vmem [#allocation2], %s470_s4 }
  0x35   : > { %s191_s10 = sshll.u32 %s184_s21, 4  ;;  %p858_p13 = pnand %p510_p12, %p831_p6  ;;  %s854_s10 = int_to_ptr.vmem [resolvable:$true] %s191_s10 }
  0x36   : > { %s181_s18 = scalar_lea.sflag [#allocation3], %s180_s26  ;;  %s597_s19 = scalar_lea.hbm %s852_s9, 128 }
  0x37   : > { %p598_p0 = scmp.ne.s32.totalorder %s852_s9, %s597_s19  ;;  %p599_p3 = pneg %p858_p13 }
  0x38   : > { %s602_s4 = scalar_lea.hbm %s962_s0, 256  ;;  %p603_p9 = scmp.lt.u32.totalorder %s852_s9, %s962_s0 }
  0x39   : > { %p600_p5 = pnand %p599_p3, %p598_p0  ;;  %p604_p1 = scmp.lt.u32.totalorder %s602_s4, %s597_s19 }
  0x3a   : > { %p606_p4 = scmp.lt.u32.totalorder %s597_s19, %s852_s9 }
  0x3b   : > { %p601_p7 = pneg %p600_p5  ;;  %p605_p2 = por %p604_p1, %p603_p9 }
  0x3d   : > { %p607_p6 = por %p606_p4, %p605_p2 }
  0x3f   : > { %p608_p8 = pnand %p607_p6, %p601_p7 }
  0x41   : > { %611 = shalt.err (!%p608_p8)
}
  0x42   : > { %s612_s26 = scalar_lea.vmem %s854_s10, 128  ;;  %s718_s7 = smov [#allocation2]  }
  0x43   : > { %p613_p12 = scmp.ne.s32.totalorder %s854_s10, %s612_s26  ;;  %s617_s8 = sshll.u32 %s718_s7, 4  ;;  %s618_s8 = int_to_ptr.vmem [resolvable:$false] %s617_s8 }
  0x44   : > { %s619_s21 = scalar_lea.vmem %s618_s8, 256  ;;  %p620_p5 = scmp.lt.s32.totalorder %s854_s10, %s618_s8 }
  0x45   : > { %p615_p11 = pnand %p613_p12, %p599_p3  ;;  %p621_p9 = scmp.lt.s32.totalorder %s619_s21, %s612_s26 }
  0x47   : > { %p616_p0 = pneg %p615_p11  ;;  %p622_p1 = por %p621_p9, %p620_p5 }
  0x49   : > { %p623_p2 = pnand %p622_p1, %p616_p0 }
  0x4b   : > { %626 = shalt.err (!%p623_p2)
}
  0x4c   : > { %504 = dma.hbm_to_vmem [thread:$0]  (!%p858_p13), %s852_s9, 128, %s854_s10, %s181_s18  }
  0x4d   : > { %p980_p7 = scmp.ne.s32.totalorder %s974_s24, 0 }
  0x4e   : > { %s890_s19 = sand.u32 (!%p980_p7), 1, %s697_s13   ;;  %p981_p3 = scmp.ne.s32.totalorder (!%p980_p7), %s972_s22, 0 }
  0x4f   : > { %200 = sbr.rel (%p980_p7) target bundleno = 359 (0x167), region = 32  ;;  %s473_s25 = sshll.u32 (!%p980_p7), %s890_s19, 3 }
  0x50   : > { %s203_s27 = scalar_lea.sflag (!%p980_p7), [#allocation3], %s890_s19  ;;  %s206_s4 = scalar_lea.vmem (!%p980_p7), [#allocation2], %s473_s25 }
  0x56   : > { %680 = dma.done.wait (%p981_p3), %s203_s27, 128  }
  0x57   : > { %682 = vsyncadd (%p981_p3), %s203_s27, 4294967168  ;;  %p982_p13 = scmp.ne.s32.totalorder %s970_s20, 0 }
  0x59   : > { %684 = dma.done.wait (%p982_p13), [#allocation6], 1024  }
  0x5a   : > { %686 = vsyncadd (%p982_p13), [#allocation6], 4294966272  ;;  %v719_v0 = vmov 0.0   ;;  %v245_v1 = vld [vmem:[#allocation5 + $0x8] sm:$0xff]  ;;  %v247_v2 = vld [vmem:[#allocation5 + $0x18] sm:$0xff]  ;;  %vm264_vm0 = vcmask 261120   ;;  %v254_v14 = vlaneseq }
  0x5b   : > { %332 = vmatprep.mubr.f32.mxu0 %v719_v0  ;;  %v244_v3 = vld [vmem:[#allocation5] sm:$0xff]  ;;  %v481_v4 = vpack.c.bf16 %v247_v2, %v245_v1  ;;  %v246_v5 = vld [vmem:[#allocation5 + $0x10] sm:$0xff]  ;;  %v249_v6 = vld [vmem:[#allocation5 + $0x28] sm:$0xff]  ;;  %s478_s24 = sshll.u32 %s705_s15, 7  ;;  %s236_s9 = scalar_lea.vmem [#allocation7], %s473_s25 }
  0x5c   : > { %v251_v7 = vld [vmem:[#allocation5 + $0x38] sm:$0xff]  ;;  %v483_v8 = vpack.c.bf16 %v246_v5, %v244_v3  ;;  %v248_v10 = vld [vmem:[#allocation5 + $0x20] sm:$0xff]  ;;  %v250_v11 = vld [vmem:[#allocation5 + $0x30] sm:$0xff]  ;;  %v255_v15 = vshrl.u32 %v254_v14, 7  ;;  %s361_s10 = sshll.u32 %s236_s9, 4  ;;  %s913_s29 = scalar_lea.hbm %s965_s3, %s478_s24  ;;  %s915_s10 = int_to_ptr.vmem [resolvable:$true] %s361_s10 }
  0x5d   : > { %v485_v9 = vpack.c.bf16 %v251_v7, %v249_v6  ;;  %482 = vmatprep.subr.bf16.mxu0 %v481_v4  ;;  %v487_v12 = vpack.c.bf16 %v250_v11, %v248_v10  ;;  %v243_v13 = vld [vmem:[%s206_s4] sm:$0xff]  ;;  %s347_s6 = scalar_lea.sflag [#allocation4], %s890_s19  ;;  %s627_s26 = scalar_lea.vmem %s915_s10, 128 }
  0x5e   : > { %484 = vmatpush1.bf16.msra.mxu0 %v483_v8  ;;  %v256_v16 = vsub.s32 0, %v255_v15  ;;  %v252_v17 = vld [vmem:[%s964_s2] sm:$0x3]  ;;  %v260_v26 = vsub.s32 1, %v255_v15  ;;  %p628_p4 = scmp.ne.s32.totalorder %s915_s10, %s627_s26  ;;  %s720_s15 = smov [#allocation7]  }
  0x5f   : > { %486 = vmatprep.subr.bf16.mxu0 %v485_v9  ;;  %s631_s7 = sshll.u32 %s720_s15, 4  ;;  %s632_s7 = int_to_ptr.vmem [resolvable:$false] %s631_s7 }
  0x60   : > { %v257_v18 = vrot.slane %v252_v17, %v256_v16  ;;  %v261_v27 = vrot.slane %v252_v17, %v260_v26  ;;  %p629_p6 = pnand %p628_p4, %p837_p10  ;;  %s633_s8 = scalar_lea.vmem %s632_s7, 256 }
  0x61   : > { %p634_p12 = scmp.lt.s32.totalorder %s915_s10, %s632_s7  ;;  %p635_p11 = scmp.lt.s32.totalorder %s633_s8, %s627_s26 }
  0x62   : > { %488 = vmatpush1.bf16.msra.mxu0 %v487_v12  ;;  %p630_p8 = pneg %p629_p6 }
  0x63   : > { %p636_p0 = por %p635_p11, %p634_p12 }
  0x65   : > { %476 = vmatmul.mubr.msk.f32.vlgmr.msra.gmra.mrb[0].mxu0 %vm264_vm0, %v243_v13  ;;  %p637_p5 = pnand %p636_p0, %p630_p8 }
 0x138   : > { %v334_v19 = vpop.f32.mrb[0].mxu0 }
 0x139   : > { %v335_v20 = vadd.f32 %v334_v19, %v257_v18  ;;  %v336_v21 = vpop.f32.mrb[1].mxu0 }
 0x13a   : > { %v337_v28 = vadd.f32 %v336_v21, %v261_v27 }
 0x13b   : > { %v339_v22 = vsub.f32 0.0, %v335_v20 }
 0x13d   : > { %v340_v23 = vmul.f32 1.442695, %v339_v22 }
 0x13f   : > { %565 = vpow2.f32 %v340_v23 }
 0x149   : > { %v566_v24 = vpop.eup %565 }
 0x14a   : > { %v342_v25 = vadd.f32 1.0, %v566_v24 }
 0x14c   : > { %567 = vrcp.f32 %v342_v25 }
 0x156   : > { %v568_v29 = vpop.eup %567 }
 0x157   : > { %v344_v30 = vmul.f32 %v568_v29, %v337_v28 }
 0x159   : > { %345 = vst [vmem:[%s236_s9] sm:$0xff] %v344_v30 }
 0x15a   : > { %640 = shalt.err (!%p637_p5)
}
 0x15b   : > { %s641_s21 = scalar_lea.hbm %s913_s29, 128  ;;  %s645_s27 = scalar_lea.hbm %s965_s3, 256 }
 0x15c   : > { %p642_p9 = scmp.ne.s32.totalorder %s913_s29, %s641_s21  ;;  %p646_p7 = scmp.lt.u32.totalorder %s913_s29, %s965_s3 }
 0x15d   : > { %p647_p3 = scmp.lt.u32.totalorder %s645_s27, %s641_s21  ;;  %p649_p4 = scmp.lt.u32.totalorder %s641_s21, %s913_s29 }
 0x15e   : > { %p643_p1 = pnand %p642_p9, %p837_p10 }
 0x15f   : > { %p648_p13 = por %p647_p3, %p646_p7 }
 0x160   : > { %p644_p2 = pneg %p643_p1 }
 0x161   : > { %p650_p6 = por %p649_p4, %p648_p13 }
 0x163   : > { %p651_p8 = pnand %p650_p6, %p644_p2 }
 0x165   : > { %654 = shalt.err (!%p651_p8)
}
 0x166   : > { %495 = dma.vmem_to_hbm [thread:$0]  (%p837_p10), %s915_s10, 128, %s913_s29, %s347_s6  }
 0x167 PF: > { %s373_s22 = sand.u32 1, %s693_s12   ;;  %p983_p12 = scmp.ne.s32.totalorder %s973_s23, 0 }
 0x168   : > { %p984_p11 = scmp.ge.s32.totalorder %s713_s17, 2  ;;  %s374_s24 = scalar_lea.sflag [#allocation4], %s373_s22 }
 0x16a   : > { %p506_p0 = pnand %p984_p11, %p983_p12 }
 0x16c   : > { %688 = dma.done.wait (!%p506_p0), %s374_s24, 128  }
 0x16d   : > { %690 = vsyncadd (!%p506_p0), %s374_s24, 4294967168  ;;  %s20_s17 = sadd.s32 1, %s713_s17   ;;  %s985_s12 = smov %s697_s13 }
 0x16e   : > { %p17_p5 = scmp.ge.s32.totalorder %s20_s17, 4   ;;  %s986_s13 = smov %s701_s14 }
 0x16f   : > { %s987_s14 = smov %s846_s5  ;;  %s988_s15 = smov %s709_s16 }
 0x170   : > { %s989_s16 = smov %s991_s28  ;;  %19 = sbr.rel (!%p17_p5) target bundleno = 7 (0x7), region = 85 }
 0x177   :  { %379 = vsyncpa [#allocation3], 1 }
 0x178   :  { %381 = vsyncpa [#allocation3 + $0x1], 1 }
 0x179   :  { %382 = vsyncpa [#allocation6], 1 }
 0x17a   :  { %383 = vsyncpa [#allocation4], 1 }
 0x17b   :  { %385 = vsyncpa [#allocation4 + $0x1], 1 }

// kernel: tpu_custom_call.1
= control target key start
LH: loop header
LB: loop body
LE: loop exit
PB: predicated region body
PF: predicated region fallthrough
CT: control target
= control target key end

     0   :  { %8 = vsyncpa [#allocation3], 0  ;;  %s962_s0 = inlined_call_operand.hbm [shape: f32[16,32], index: 0, kind: input, shape index: {}]   ;;  %s963_s1 = inlined_call_operand.hbm [shape: f32[32,256], index: 1, kind: input, shape index: {}]   ;;  %s964_s2 = inlined_call_operand.vmem [shape: f32[1,256], index: 2, kind: input, shape index: {}]   ;;  %s965_s3 = inlined_call_operand.hbm [shape: f32[16,128], index: 3, kind: output, shape index: {}]  }
   0x1   :  { %10 = vsyncpa [#allocation3 + $0x1], 0 }
   0x2   :  { %11 = vsyncpa [#allocation6], 0 }
   0x3   :  { %12 = vsyncpa [#allocation4], 0 }
   0x4   :  { %14 = vsyncpa [#allocation4 + $0x1], 0  ;;  %s741_s12 = smov 0   ;;  %s743_s13 = smov 0  }
   0x5   :  { %s745_s14 = smov 0   ;;  %s747_s15 = smov 0  }
   0x6   :  { %s749_s16 = smov 0   ;;  %s751_s17 = smov 0  }
   0x7 LB: > { %s464_s18 = sadd.s32 4294967295, %s713_s17   ;;  %s465_s19 = sadd.s32 4294967294, %s713_s17   ;;  %s713_s17 = sphi %s751_s17, %s20_s17   ;;  %s709_s16 = sphi %s749_s16, %s989_s16   ;;  %s705_s15 = sphi %s747_s15, %s988_s15   ;;  %s701_s14 = sphi %s745_s14, %s987_s14   ;;  %s697_s13 = sphi %s743_s13, %s986_s13   ;;  %s693_s12 = sphi %s741_s12, %s985_s12  }
   0x8   : > { %p52_p0 = scmp.ne.s32.totalorder %s697_s13, %s693_s12  ;;  %p775_p1 = scmp.eq.s32.totalorder %s464_s18, 0 }
   0x9   : > { %p779_p2 = scmp.eq.s32.totalorder %s464_s18, 1  ;;  %p136_p3 = scmp.eq.s32.totalorder %s465_s19, 1 }
   0xa   : > { %s970_s20 = scalar_select %p775_p1, 1, 0 }
   0xb   : > { %s971_s21 = scalar_select %p779_p2, 1, 0 }
   0xc   : > { %p785_p4 = por %p775_p1, %p52_p0  ;;  %p466_p5 = scmp.ge.s32.totalorder %s713_s17, 1 }
   0xd   : > { %p790_p6 = por %p136_p3, %p52_p0  ;;  %p143_p7 = scmp.lt.s32.totalorder %s713_s17, 3 }
   0xe   : > { %s972_s22 = scalar_select %p785_p4, 1, 0 }
   0xf   : > { %s973_s23 = scalar_select %p790_p6, 1, 0 }
  0x10   : > { %p795_p8 = pnand %p466_p5, %p143_p7  ;;  %s715_s25 = smov [#allocation5]  }
  0x11   : > { %s158_s26 = sshll.u32 %s715_s25, 4  ;;  %s32_s28 = sadd.s32 1, %s709_s16  ;;  %s159_s26 = int_to_ptr.vmem [resolvable:$true] %s158_s26 }
  0x12   : > { %s974_s24 = scalar_select %p795_p8, 1, 0 }
  0x13   : > { %p497_p9 = pneg %p795_p8  ;;  %s569_s4 = scalar_lea.hbm %s963_s1, 1024 }
  0x14   : > { %p570_p12 = scmp.ne.s32.totalorder %s963_s1, %s569_s4  ;;  %p576_p5 = scmp.lt.u32.totalorder %s569_s4, %s963_s1 }
  0x15   : > { %p804_p11 = pnand %p497_p9, %p775_p1 }
  0x17   : > { %p571_p13 = pneg %p804_p11 }
  0x19   : > { %p572_p0 = pnand %p571_p13, %p570_p12 }
  0x1b   : > { %p573_p3 = pneg %p572_p0 }
  0x1d   : > { %p578_p7 = pnand %p576_p5, %p573_p3 }
  0x1f   : > { %581 = shalt.err (!%p578_p7)
}
  0x20   : > { %s582_s9 = scalar_lea.vmem %s159_s26, 1024  ;;  %p590_p1 = scmp.lt.s32.totalorder %s159_s26, %s159_s26 }
  0x21   : > { %p583_p9 = scmp.ne.s32.totalorder %s159_s26, %s582_s9  ;;  %p591_p4 = scmp.lt.s32.totalorder %s582_s9, %s582_s9 }
  0x23   : > { %p585_p10 = pnand %p583_p9, %p571_p13  ;;  %p592_p8 = por %p591_p4, %p590_p1 }
  0x25   : > { %p586_p6 = pneg %p585_p10 }
  0x27   : > { %p593_p2 = pnand %p592_p8, %p586_p6 }
  0x29   : > { %596 = shalt.err (!%p593_p2)
}
  0x2a   : > { %s716_s10 = smov 256   ;;  %s717_s11 = smov 16  }
  0x2b   : > { %500 = dma.hbm_to_vmem [thread:$0]  (!%p804_p11), %s963_s1, 1024, %s159_s26, [#allocation6], %s716_s10, %s716_s10, %s717_s11  }
  0x2c   : > { %p34_p1 = scmp.ge.s32.totalorder %s32_s28, 2  ;;  %s39_s25 = sadd.s32 1, %s701_s14 }
  0x2d   : > { %p46_p2 = scmp.ne.s32.totalorder %s701_s14, %s697_s13  ;;  %p47_p4 = scmp.eq.s32.totalorder %s713_s17, 0 }
  0x2e   : > { %s991_s28 = smov (%p34_p1, %s32_s28), 0  ;;  %p977_p8 = scmp.ne.s32.totalorder %s971_s21, 0 }
  0x2f   : > { %p831_p6 = por %p47_p4, %p46_p2  ;;  %s36_s27 = ssub.s32 %s709_s16, %s991_s28 }
  0x30   : > { %p837_p10 = por %p977_p8, %p46_p2  ;;  %p510_p12 = scmp.lt.s32.totalorder %s713_s17, 2 }
  0x31   : > { %p37_p11 = scmp.eq.s32.totalorder %s36_s27, 0  ;;  %s180_s26 = sand.u32 1, %s701_s14  }
  0x32   : > { %s470_s4 = sshll.u32 %s180_s26, 3  ;;  %s471_s6 = sshll.u32 %s709_s16, 7 }
  0x33   : > { %s846_s5 = scalar_select %p37_p11, %s701_s14, %s39_s25  }
  0x34   : > { %s852_s9 = scalar_lea.hbm %s962_s0, %s471_s6  ;;  %s184_s21 = scalar_lea.vmem [#allocation2], %s470_s4 }
  0x35   : > { %s191_s10 = sshll.u32 %s184_s21, 4  ;;  %p858_p13 = pnand %p510_p12, %p831_p6  ;;  %s854_s10 = int_to_ptr.vmem [resolvable:$true] %s191_s10 }
  0x36   : > { %s181_s18 = scalar_lea.sflag [#allocation3], %s180_s26  ;;  %s597_s19 = scalar_lea.hbm %s852_s9, 128 }
  0x37   : > { %p598_p0 = scmp.ne.s32.totalorder %s852_s9, %s597_s19  ;;  %p599_p3 = pneg %p858_p13 }
  0x38   : > { %s602_s4 = scalar_lea.hbm %s962_s0, 256  ;;  %p603_p9 = scmp.lt.u32.totalorder %s852_s9, %s962_s0 }
  0x39   : > { %p600_p5 = pnand %p599_p3, %p598_p0  ;;  %p604_p1 = scmp.lt.u32.totalorder %s602_s4, %s597_s19 }
  0x3a   : > { %p606_p4 = scmp.lt.u32.totalorder %s597_s19, %s852_s9 }
  0x3b   : > { %p601_p7 = pneg %p600_p5  ;;  %p605_p2 = por %p604_p1, %p603_p9 }
  0x3d   : > { %p607_p6 = por %p606_p4, %p605_p2 }
  0x3f   : > { %p608_p8 = pnand %p607_p6, %p601_p7 }
  0x41   : > { %611 = shalt.err (!%p608_p8)
}
  0x42   : > { %s612_s26 = scalar_lea.vmem %s854_s10, 128  ;;  %s718_s7 = smov [#allocation2]  }
  0x43   : > { %p613_p12 = scmp.ne.s32.totalorder %s854_s10, %s612_s26  ;;  %s617_s8 = sshll.u32 %s718_s7, 4  ;;  %s618_s8 = int_to_ptr.vmem [resolvable:$false] %s617_s8 }
  0x44   : > { %s619_s21 = scalar_lea.vmem %s618_s8, 256  ;;  %p620_p5 = scmp.lt.s32.totalorder %s854_s10, %s618_s8 }
  0x45   : > { %p615_p11 = pnand %p613_p12, %p599_p3  ;;  %p621_p9 = scmp.lt.s32.totalorder %s619_s21, %s612_s26 }
  0x47   : > { %p616_p0 = pneg %p615_p11  ;;  %p622_p1 = por %p621_p9, %p620_p5 }
  0x49   : > { %p623_p2 = pnand %p622_p1, %p616_p0 }
  0x4b   : > { %626 = shalt.err (!%p623_p2)
}
  0x4c   : > { %504 = dma.hbm_to_vmem [thread:$0]  (!%p858_p13), %s852_s9, 128, %s854_s10, %s181_s18  }
  0x4d   : > { %p980_p7 = scmp.ne.s32.totalorder %s974_s24, 0 }
  0x4e   : > { %s890_s19 = sand.u32 (!%p980_p7), 1, %s697_s13   ;;  %p981_p3 = scmp.ne.s32.totalorder (!%p980_p7), %s972_s22, 0 }
  0x4f   : > { %200 = sbr.rel (%p980_p7) target bundleno = 359 (0x167), region = 32  ;;  %s473_s25 = sshll.u32 (!%p980_p7), %s890_s19, 3 }
  0x50   : > { %s203_s27 = scalar_lea.sflag (!%p980_p7), [#allocation3], %s890_s19  ;;  %s206_s4 = scalar_lea.vmem (!%p980_p7), [#allocation2], %s473_s25 }
  0x56   : > { %680 = dma.done.wait (%p981_p3), %s203_s27, 128  }
  0x57   : > { %682 = vsyncadd (%p981_p3), %s203_s27, 4294967168  ;;  %p982_p13 = scmp.ne.s32.totalorder %s970_s20, 0 }
  0x59   : > { %684 = dma.done.wait (%p982_p13), [#allocation6], 1024  }
  0x5a   : > { %686 = vsyncadd (%p982_p13), [#allocation6], 4294966272  ;;  %v719_v0 = vmov 0.0   ;;  %v245_v1 = vld [vmem:[#allocation5 + $0x8] sm:$0xff]  ;;  %v247_v2 = vld [vmem:[#allocation5 + $0x18] sm:$0xff]  ;;  %vm264_vm0 = vcmask 261120   ;;  %v254_v14 = vlaneseq }
  0x5b   : > { %332 = vmatprep.mubr.f32.mxu0 %v719_v0  ;;  %v244_v3 = vld [vmem:[#allocation5] sm:$0xff]  ;;  %v481_v4 = vpack.c.bf16 %v247_v2, %v245_v1  ;;  %v246_v5 = vld [vmem:[#allocation5 + $0x10] sm:$0xff]  ;;  %v249_v6 = vld [vmem:[#allocation5 + $0x28] sm:$0xff]  ;;  %s478_s24 = sshll.u32 %s705_s15, 7  ;;  %s236_s9 = scalar_lea.vmem [#allocation7], %s473_s25 }
  0x5c   : > { %v251_v7 = vld [vmem:[#allocation5 + $0x38] sm:$0xff]  ;;  %v483_v8 = vpack.c.bf16 %v246_v5, %v244_v3  ;;  %v248_v10 = vld [vmem:[#allocation5 + $0x20] sm:$0xff]  ;;  %v250_v11 = vld [vmem:[#allocation5 + $0x30] sm:$0xff]  ;;  %v255_v15 = vshrl.u32 %v254_v14, 7  ;;  %s361_s10 = sshll.u32 %s236_s9, 4  ;;  %s913_s29 = scalar_lea.hbm %s965_s3, %s478_s24  ;;  %s915_s10 = int_to_ptr.vmem [resolvable:$true] %s361_s10 }
  0x5d   : > { %v485_v9 = vpack.c.bf16 %v251_v7, %v249_v6  ;;  %482 = vmatprep.subr.bf16.mxu0 %v481_v4  ;;  %v487_v12 = vpack.c.bf16 %v250_v11, %v248_v10  ;;  %v243_v13 = vld [vmem:[%s206_s4] sm:$0xff]  ;;  %s347_s6 = scalar_lea.sflag [#allocation4], %s890_s19  ;;  %s627_s26 = scalar_lea.vmem %s915_s10, 128 }
  0x5e   : > { %484 = vmatpush1.bf16.msra.mxu0 %v483_v8  ;;  %v256_v16 = vsub.s32 0, %v255_v15  ;;  %v252_v17 = vld [vmem:[%s964_s2] sm:$0x3]  ;;  %v260_v26 = vsub.s32 1, %v255_v15  ;;  %p628_p4 = scmp.ne.s32.totalorder %s915_s10, %s627_s26  ;;  %s720_s15 = smov [#allocation7]  }
  0x5f   : > { %486 = vmatprep.subr.bf16.mxu0 %v485_v9  ;;  %s631_s7 = sshll.u32 %s720_s15, 4  ;;  %s632_s7 = int_to_ptr.vmem [resolvable:$false] %s631_s7 }
  0x60   : > { %v257_v18 = vrot.slane %v252_v17, %v256_v16  ;;  %v261_v27 = vrot.slane %v252_v17, %v260_v26  ;;  %p629_p6 = pnand %p628_p4, %p837_p10  ;;  %s633_s8 = scalar_lea.vmem %s632_s7, 256 }
  0x61   : > { %p634_p12 = scmp.lt.s32.totalorder %s915_s10, %s632_s7  ;;  %p635_p11 = scmp.lt.s32.totalorder %s633_s8, %s627_s26 }
  0x62   : > { %488 = vmatpush1.bf16.msra.mxu0 %v487_v12  ;;  %p630_p8 = pneg %p629_p6 }
  0x63   : > { %p636_p0 = por %p635_p11, %p634_p12 }
  0x65   : > { %476 = vmatmul.mubr.msk.f32.vlgmr.msra.gmra.mrb[0].mxu0 %vm264_vm0, %v243_v13  ;;  %p637_p5 = pnand %p636_p0, %p630_p8 }
 0x138   : > { %v334_v19 = vpop.f32.mrb[0].mxu0 }
 0x139   : > { %v335_v20 = vadd.f32 %v334_v19, %v257_v18  ;;  %v336_v21 = vpop.f32.mrb[1].mxu0 }
 0x13a   : > { %v337_v28 = vadd.f32 %v336_v21, %v261_v27 }
 0x13b   : > { %v339_v22 = vsub.f32 0.0, %v335_v20 }
 0x13d   : > { %v340_v23 = vmul.f32 1.442695, %v339_v22 }
 0x13f   : > { %565 = vpow2.f32 %v340_v23 }
 0x149   : > { %v566_v24 = vpop.eup %565 }
 0x14a   : > { %v342_v25 = vadd.f32 1.0, %v566_v24 }
 0x14c   : > { %567 = vrcp.f32 %v342_v25 }
 0x156   : > { %v568_v29 = vpop.eup %567 }
 0x157   : > { %v344_v30 = vmul.f32 %v568_v29, %v337_v28 }
 0x159   : > { %345 = vst [vmem:[%s236_s9] sm:$0xff] %v344_v30 }
 0x15a   : > { %640 = shalt.err (!%p637_p5)
}
 0x15b   : > { %s641_s21 = scalar_lea.hbm %s913_s29, 128  ;;  %s645_s27 = scalar_lea.hbm %s965_s3, 256 }
 0x15c   : > { %p642_p9 = scmp.ne.s32.totalorder %s913_s29, %s641_s21  ;;  %p646_p7 = scmp.lt.u32.totalorder %s913_s29, %s965_s3 }
 0x15d   : > { %p647_p3 = scmp.lt.u32.totalorder %s645_s27, %s641_s21  ;;  %p649_p4 = scmp.lt.u32.totalorder %s641_s21, %s913_s29 }
 0x15e   : > { %p643_p1 = pnand %p642_p9, %p837_p10 }
 0x15f   : > { %p648_p13 = por %p647_p3, %p646_p7 }
 0x160   : > { %p644_p2 = pneg %p643_p1 }
 0x161   : > { %p650_p6 = por %p649_p4, %p648_p13 }
 0x163   : > { %p651_p8 = pnand %p650_p6, %p644_p2 }
 0x165   : > { %654 = shalt.err (!%p651_p8)
}
 0x166   : > { %495 = dma.vmem_to_hbm [thread:$0]  (%p837_p10), %s915_s10, 128, %s913_s29, %s347_s6  }
 0x167 PF: > { %s373_s22 = sand.u32 1, %s693_s12   ;;  %p983_p12 = scmp.ne.s32.totalorder %s973_s23, 0 }
 0x168   : > { %p984_p11 = scmp.ge.s32.totalorder %s713_s17, 2  ;;  %s374_s24 = scalar_lea.sflag [#allocation4], %s373_s22 }
 0x16a   : > { %p506_p0 = pnand %p984_p11, %p983_p12 }
 0x16c   : > { %688 = dma.done.wait (!%p506_p0), %s374_s24, 128  }
 0x16d   : > { %690 = vsyncadd (!%p506_p0), %s374_s24, 4294967168  ;;  %s20_s17 = sadd.s32 1, %s713_s17   ;;  %s985_s12 = smov %s697_s13 }
 0x16e   : > { %p17_p5 = scmp.ge.s32.totalorder %s20_s17, 4   ;;  %s986_s13 = smov %s701_s14 }
 0x16f   : > { %s987_s14 = smov %s846_s5  ;;  %s988_s15 = smov %s709_s16 }
 0x170   : > { %s989_s16 = smov %s991_s28  ;;  %19 = sbr.rel (!%p17_p5) target bundleno = 7 (0x7), region = 85 }
 0x177   :  { %379 = vsyncpa [#allocation3], 1 }
 0x178   :  { %381 = vsyncpa [#allocation3 + $0x1], 1 }
 0x179   :  { %382 = vsyncpa [#allocation6], 1 }
 0x17a   :  { %383 = vsyncpa [#allocation4], 1 }
 0x17b   :  { %385 = vsyncpa [#allocation4 + $0x1], 1 }

</bundles_post_ra>
